<compile_context>
chip_gen: v7x
topology: tpu7x:2x2x1
jax: 0.10.0
libtpu: 0.0.40
codegen_flags: <defaults>
</compile_context>

<pallas_src>
import jax
import jax.numpy as jnp
from jax.experimental import pallas as pl
from jax.experimental.pallas import tpu as pltpu


def _round_up(x, m):
    return ((x + m - 1) // m) * m


def make_cavia_forward(params, num_context_params, *, tile_m=512, mxu_dtype=jnp.bfloat16):
    """Builds a jitted forward for a CaviaModel.

    params: list of (Wx, Wc, b) per Linear layer with Wx: (in_k, out_k),
    Wc: (num_context_params[k], out_k), b: (1, out_k), so that
    cat(x, ctx) @ W_torch.T + b == x @ Wx + ctx @ Wc + b.
    Weights are packed once here (they are fixed across CAVIA inner-loop steps);
    only the ctx-dependent effective bias is recomputed per call.
    """
    num_context_params = tuple(int(n) for n in num_context_params)
    n_layers = len(params)
    assert n_layers >= 2 and len(num_context_params) == n_layers

    in_dims = [int(wx.shape[0]) for (wx, _, _) in params]
    out_dims = [int(wx.shape[1]) for (wx, _, _) in params]
    n_in0 = in_dims[0]
    n_out = out_dims[-1]
    fpad = _round_up(max(out_dims), 128)          # one lane-dense width for all layer outputs

    # ---- one-time, ctx-independent packing (done at construction, not per call) ----
    # First layer's data-weight keeps its true contraction width (no 8x K padding).
    w0 = jnp.pad(params[0][0].astype(jnp.float32),
                 ((0, 0), (0, fpad - out_dims[0]))).astype(mxu_dtype)          # (n_in0, fpad)
    # Remaining layers' data-weights packed into one (n_layers-1, fpad, fpad) array.
    w_rest = jnp.stack([
        jnp.pad(params[k][0].astype(jnp.float32),
                ((0, fpad - in_dims[k]), (0, fpad - out_dims[k])))
        for k in range(1, n_layers)
    ]).astype(mxu_dtype)                                                       # (L-1, fpad, fpad)

    wc_list = [wc.astype(jnp.float32) for (_, wc, _) in params]
    b_list = [b.astype(jnp.float32).reshape(1, -1) for (_, _, b) in params]

    ctx_offsets = []
    off = 0
    for nc in num_context_params:
        ctx_offsets.append(off)
        off += nc
    total_ctx = off

    def kernel(x_ref, w0_ref, wr_ref, b_ref, o_ref):
        # Layer 0: (tm, n_in0) @ (n_in0, fpad); accumulate in f32 on the MXU.
        h = jnp.dot(x_ref[...], w0_ref[...], preferred_element_type=jnp.float32)
        h = h + b_ref[0]                                  # f32 bias add (VPU)
        for k in range(1, n_layers):                      # statically unrolled (small n_layers)
            h = jnp.maximum(h, 0.0)                       # ReLU on every layer except the last
            h = jnp.dot(h.astype(mxu_dtype), wr_ref[k - 1],
                        preferred_element_type=jnp.float32) + b_ref[k]
        o_ref[...] = h.astype(o_ref.dtype)

    @jax.jit
    def forward(x, ctx):
        # CAVIA semantics: one shared context row for the whole batch.
        assert ctx.shape == (1, total_ctx), "ctx must be a single shared row (1, sum(ncp))"
        B = x.shape[0]

        # ---- per-call: fold ctx @ Wc + b into a per-layer effective bias (tiny) ----
        eff_b = []
        for k in range(n_layers):
            nc = num_context_params[k]
            c = ctx[:, ctx_offsets[k]:ctx_offsets[k] + nc].astype(jnp.float32)
            eb = jnp.dot(c, wc_list[k], preferred_element_type=jnp.float32) + b_list[k]
            eff_b.append(jnp.pad(eb, ((0, 0), (0, fpad - out_dims[k]))))
        b_pack = jnp.stack(eff_b)                          # (n_layers, 1, fpad) f32

        # ---- batch-only padding (feature dim of x keeps its true width) ----
        if B <= tile_m:
            tm = _round_up(max(B, 8), 8)                   # single full-extent tile
        else:
            tm = tile_m                                    # >=2 grid steps (v7x megacore)
        bpad = _round_up(B, tm)
        x_pad = jnp.pad(x.astype(mxu_dtype), ((0, bpad - B), (0, 0)))

        # Scoped-VMEM hint only if the working set would exceed the v5e default (16 MiB).
        itemsize = jnp.dtype(mxu_dtype).itemsize
        vmem_need = (2 * tm * n_in0 * itemsize             # x tile, double buffered
                     + 2 * tm * fpad * 4                   # out tile, double buffered
                     + 2 * (n_in0 * fpad * itemsize
                            + (n_layers - 1) * fpad * fpad * itemsize
                            + n_layers * fpad * 4))        # weights / bias
        vmem_limit = None
        if vmem_need > 12 * 1024 * 1024:
            vmem_limit = min(int(vmem_need * 2), 64 * 1024 * 1024)  # stay <= v7x physical

        out = pl.pallas_call(
            kernel,
            out_shape=jax.ShapeDtypeStruct((bpad, fpad), jnp.float32),
            grid=(bpad // tm,),
            in_specs=[
                pl.BlockSpec((tm, n_in0), lambda i: (i, 0)),                    # x rows (true width)
                pl.BlockSpec((n_in0, fpad), lambda i: (0, 0)),                  # first-layer W
                pl.BlockSpec((n_layers - 1, fpad, fpad), lambda i: (0, 0, 0)),  # packed rest W
                pl.BlockSpec((n_layers, 1, fpad), lambda i: (0, 0, 0)),         # packed eff bias
            ],
            out_specs=pl.BlockSpec((tm, fpad), lambda i: (i, 0)),
            compiler_params=pltpu.CompilerParams(
                dimension_semantics=("parallel",),
                vmem_limit_bytes=vmem_limit),
        )(x_pad, w0, w_rest, b_pack)

        return out[:B, :n_out]

    return forward


def _init_linear(key, fan_in_total, n_in_data, n_ctx, n_out):
    """Deterministic nn.Linear-style init, split into data/context halves (transposed)."""
    k_w, k_b = jax.random.split(key)
    bound = 1.0 / jnp.sqrt(jnp.float32(fan_in_total))
    w_full = jax.random.uniform(k_w, (n_out, fan_in_total), jnp.float32, -bound, bound)
    b = jax.random.uniform(k_b, (1, n_out), jnp.float32, -bound, bound)
    wx = w_full[:, :n_in_data].T          # (n_in_data, n_out)
    wc = w_full[:, n_in_data:].T          # (n_ctx, n_out)
    return wx, wc, b


def reference(x, ctx, params, num_context_params):
    """Pure-JAX mirror of the PyTorch forward (with concatenation), all f32."""
    h = x
    off = 0
    for k, (wx, wc, b) in enumerate(params):
        nc = num_context_params[k]
        c = jnp.broadcast_to(ctx[:, off:off + nc], (h.shape[0], nc))
        off += nc
        hc = jnp.concatenate([h, c], axis=1)
        w_full = jnp.concatenate([wx, wc], axis=0)        # (in_total, out)
        h = hc @ w_full + b
        if k < len(params) - 1:
            h = jnp.maximum(h, 0.0)
    return h


if __name__ == "__main__":
    # Small shapes consistent with the module.
    n_in = 16
    n_out = 8
    n_hidden = [32, 32]
    num_context_params = [4, 4, 4]        # len == len(n_hidden) + 1
    batch = 777                           # > tile_m -> 2-step batch grid + row padding

    key = jax.random.PRNGKey(0)
    keys = jax.random.split(key, len(n_hidden) + 3)

    layer_in = [n_in] + n_hidden
    layer_out = n_hidden + [n_out]
    params = []
    for k in range(len(layer_in)):
        params.append(_init_linear(
            keys[k],
            fan_in_total=layer_in[k] + num_context_params[k],
            n_in_data=layer_in[k],
            n_ctx=num_context_params[k],
            n_out=layer_out[k],
        ))

    # reset_context_params() gives zeros; use nonzero deterministic context values
    # to exercise the set_context_params path meaningfully.
    x = jax.random.normal(keys[-2], (batch, n_in), jnp.float32)
    ctx = jax.random.normal(keys[-1], (1, sum(num_context_params)), jnp.float32) * 0.1

    # bf16 MXU operands (recommended on v6e / v7x, halves traffic on v5e)...
    fwd_bf16 = make_cavia_forward(params, num_context_params, tile_m=512,
                                  mxu_dtype=jnp.bfloat16)
    # ...plus an exact f32 variant used to validate the kernel structure tightly.
    fwd_f32 = make_cavia_forward(params, num_context_params, tile_m=512,
                                 mxu_dtype=jnp.float32)

    y_bf16 = jax.block_until_ready(fwd_bf16(x, ctx))
    y_f32 = jax.block_until_ready(fwd_f32(x, ctx))

    y_ref = reference(x, ctx, params, num_context_params)

    assert y_f32.shape == (batch, n_out) and y_bf16.shape == (batch, n_out)
    assert jnp.allclose(y_f32, y_ref, atol=1e-4, rtol=1e-4), "f32 kernel mismatch vs reference"
    # bf16 operands introduce ~1% quantization error; loose tolerance by design.
    assert jnp.allclose(y_bf16, y_ref, atol=1e-1, rtol=1e-1), "bf16 kernel mismatch vs reference"
    print("KERNEL_OK")
</pallas_src>

<mosaic_0001>
module attributes {stable_mosaic.version = 11 : i64} {
  func.func @kernel(%arg0: i32, %arg1: memref<512x16xbf16, #tpu.memory_space<vmem>>, %arg2: memref<16x128xbf16, #tpu.memory_space<vmem>>, %arg3: memref<2x128x128xbf16, #tpu.memory_space<vmem>>, %arg4: memref<3x1x128xf32, #tpu.memory_space<vmem>>, %arg5: memref<512x128xf32, #tpu.memory_space<vmem>>) attributes {dimension_semantics = [#tpu.dimension_semantics<parallel>], iteration_bounds = array<i64: 2>, scalar_prefetch = 0 : i64, scratch_operands = 0 : i64, tpu.core_type = #tpu.core_type<tc>, window_params = [{transform_indices = @transform_0, window_bounds = array<i64: 512, 16>}, {pipeline_mode = #tpu.pipeline_mode<synchronous>, transform_indices = @transform_1, window_bounds = array<i64: 16, 128>}, {pipeline_mode = #tpu.pipeline_mode<synchronous>, transform_indices = @transform_2, window_bounds = array<i64: 2, 128, 128>}, {pipeline_mode = #tpu.pipeline_mode<synchronous>, transform_indices = @transform_3, window_bounds = array<i64: 3, 1, 128>}, {transform_indices = @transform_4, window_bounds = array<i64: 512, 128>}]} {
    %c0 = arith.constant 0 : index
    %c0_0 = arith.constant 0 : index
    %0 = vector.load %arg1[%c0, %c0_0] : memref<512x16xbf16, #tpu.memory_space<vmem>>, vector<512x16xbf16>
    %c0_1 = arith.constant 0 : index
    %c0_2 = arith.constant 0 : index
    %1 = vector.load %arg2[%c0_1, %c0_2] : memref<16x128xbf16, #tpu.memory_space<vmem>>, vector<16x128xbf16>
    %cst = arith.constant dense<0.000000e+00> : vector<512x128xf32>
    %2 = tpu.matmul %0, %1, %cst {dimension_numbers = #tpu.dot_dimension_numbers<[1], [0], [0], [1], [0, 0, 1, 1], [], []>} : vector<512x16xbf16>, vector<16x128xbf16>, vector<512x128xf32> -> vector<512x128xf32>
    %c0_3 = arith.constant 0 : index
    %c0_4 = arith.constant 0 : index
    %c0_5 = arith.constant 0 : index
    %3 = vector.load %arg4[%c0_3, %c0_4, %c0_5] : memref<3x1x128xf32, #tpu.memory_space<vmem>>, vector<1x1x128xf32>
    %4 = vector.shape_cast %3 : vector<1x1x128xf32> to vector<1x128xf32>
    %5 = vector.broadcast %4 : vector<1x128xf32> to vector<512x128xf32>
    %6 = arith.addf %2, %5 : vector<512x128xf32>
    %cst_6 = arith.constant 0.000000e+00 : f32
    %7 = vector.broadcast %cst_6 : f32 to vector<512x128xf32>
    %8 = arith.maximumf %6, %7 : vector<512x128xf32>
    %9 = arith.truncf %8 : vector<512x128xf32> to vector<512x128xbf16>
    %c0_7 = arith.constant 0 : index
    %c0_8 = arith.constant 0 : index
    %c0_9 = arith.constant 0 : index
    %10 = vector.load %arg3[%c0_7, %c0_8, %c0_9] : memref<2x128x128xbf16, #tpu.memory_space<vmem>>, vector<1x128x128xbf16>
    %11 = vector.shape_cast %10 : vector<1x128x128xbf16> to vector<128x128xbf16>
    %cst_10 = arith.constant dense<0.000000e+00> : vector<512x128xf32>
    %12 = tpu.matmul %9, %11, %cst_10 {dimension_numbers = #tpu.dot_dimension_numbers<[1], [0], [0], [1], [0, 0, 1, 1], [], []>} : vector<512x128xbf16>, vector<128x128xbf16>, vector<512x128xf32> -> vector<512x128xf32>
    %c1 = arith.constant 1 : index
    %c0_11 = arith.constant 0 : index
    %c0_12 = arith.constant 0 : index
    %13 = vector.load %arg4[%c1, %c0_11, %c0_12] : memref<3x1x128xf32, #tpu.memory_space<vmem>>, vector<1x1x128xf32>
    %14 = vector.shape_cast %13 : vector<1x1x128xf32> to vector<1x128xf32>
    %15 = vector.broadcast %14 : vector<1x128xf32> to vector<512x128xf32>
    %16 = arith.addf %12, %15 : vector<512x128xf32>
    %cst_13 = arith.constant 0.000000e+00 : f32
    %17 = vector.broadcast %cst_13 : f32 to vector<512x128xf32>
    %18 = arith.maximumf %16, %17 : vector<512x128xf32>
    %19 = arith.truncf %18 : vector<512x128xf32> to vector<512x128xbf16>
    %c1_14 = arith.constant 1 : index
    %c0_15 = arith.constant 0 : index
    %c0_16 = arith.constant 0 : index
    %20 = vector.load %arg3[%c1_14, %c0_15, %c0_16] : memref<2x128x128xbf16, #tpu.memory_space<vmem>>, vector<1x128x128xbf16>
    %21 = vector.shape_cast %20 : vector<1x128x128xbf16> to vector<128x128xbf16>
    %cst_17 = arith.constant dense<0.000000e+00> : vector<512x128xf32>
    %22 = tpu.matmul %19, %21, %cst_17 {dimension_numbers = #tpu.dot_dimension_numbers<[1], [0], [0], [1], [0, 0, 1, 1], [], []>} : vector<512x128xbf16>, vector<128x128xbf16>, vector<512x128xf32> -> vector<512x128xf32>
    %c2 = arith.constant 2 : index
    %c0_18 = arith.constant 0 : index
    %c0_19 = arith.constant 0 : index
    %23 = vector.load %arg4[%c2, %c0_18, %c0_19] : memref<3x1x128xf32, #tpu.memory_space<vmem>>, vector<1x1x128xf32>
    %24 = vector.shape_cast %23 : vector<1x1x128xf32> to vector<1x128xf32>
    %25 = vector.broadcast %24 : vector<1x128xf32> to vector<512x128xf32>
    %26 = arith.addf %22, %25 : vector<512x128xf32>
    %c0_20 = arith.constant 0 : index
    %c0_21 = arith.constant 0 : index
    %27 = vector.load %arg5[%c0_20, %c0_21] : memref<512x128xf32, #tpu.memory_space<vmem>>, vector<512x128xf32>
    tpu.vector_store %arg5[%c0_20, %c0_21], %26 {strides = array<i32>} : memref<512x128xf32, #tpu.memory_space<vmem>>, vector<512x128xf32>,
    return
  }
  func.func @transform_0(%arg0: i32) -> (i32, i32) {
    %c0_i32 = arith.constant 0 : i32
    %c0_i32_0 = arith.constant 0 : i32
    return %arg0, %c0_i32 : i32, i32
  }
  func.func @transform_1(%arg0: i32) -> (i32, i32) {
    %c0_i32 = arith.constant 0 : i32
    %c0_i32_0 = arith.constant 0 : i32
    %c0_i32_1 = arith.constant 0 : i32
    return %c0_i32, %c0_i32_0 : i32, i32
  }
  func.func @transform_2(%arg0: i32) -> (i32, i32, i32) {
    %c0_i32 = arith.constant 0 : i32
    %c0_i32_0 = arith.constant 0 : i32
    %c0_i32_1 = arith.constant 0 : i32
    %c0_i32_2 = arith.constant 0 : i32
    return %c0_i32, %c0_i32_0, %c0_i32_1 : i32, i32, i32
  }
  func.func @transform_3(%arg0: i32) -> (i32, i32, i32) {
    %c0_i32 = arith.constant 0 : i32
    %c0_i32_0 = arith.constant 0 : i32
    %c0_i32_1 = arith.constant 0 : i32
    %c0_i32_2 = arith.constant 0 : i32
    return %c0_i32, %c0_i32_0, %c0_i32_1 : i32, i32, i32
  }
  func.func @transform_4(%arg0: i32) -> (i32, i32) {
    %c0_i32 = arith.constant 0 : i32
    %c0_i32_0 = arith.constant 0 : i32
    return %arg0, %c0_i32 : i32, i32
  }
}

</mosaic_0001>

<bundles_post_ra>
// kernel: forward.1
= control target key start
LH: loop header
LB: loop body
LE: loop exit
PB: predicated region body
PF: predicated region fallthrough
CT: control target
= control target key end

     0   :  { %s2406_s15 = smov 0   ;;  %s2847_s0 = inlined_call_operand.vmem [shape: bf16[1024,16], index: 0, kind: input, shape index: {}]   ;;  %s2848_s1 = inlined_call_operand.vmem [shape: bf16[16,128], index: 1, kind: input, shape index: {}]   ;;  %s2849_s2 = inlined_call_operand.vmem [shape: bf16[2,128,128], index: 2, kind: input, shape index: {}]   ;;  %s2850_s3 = inlined_call_operand.vmem [shape: f32[3,1,128], index: 3, kind: input, shape index: {}]   ;;  %s2851_s4 = inlined_call_operand.vmem [shape: f32[1024,128], index: 4, kind: output, shape index: {}]  }
   0x1 LB: > { %s1862_s16 = sadd.s32 4294967295, %s2379_s15   ;;  %p1866_p0 = scmp.ge.s32.totalorder %s2379_s15, 1  ;;  %s2379_s15 = sphi %s2406_s15, %s14_s15  }
   0x2   : > { %p163_p1 = scmp.lt.s32.totalorder %s2379_s15, 3 }
   0x4   : > { %p164_p2 = pnand %p1866_p0, %p163_p1 }
   0x5   : > { %v2324_v0 = vld [vmem:[%s2848_s1] sm:$0xff] (!%p164_p2)   ;;  %s1867_s19 = sshll.u32 (!%p164_p2), %s1862_s16, 6  ;;  %vm441_vm0 = vcmask (!%p164_p2), 130048   ;;  %v2358_v10 = vld [vmem:[%s2849_s2 + $0x8] sm:$0xff] (!%p164_p2)   ;;  %v2359_v13 = vld [vmem:[%s2849_s2 + $0x10] sm:$0xff] (!%p164_p2)  }
   0x6   : > { %167 = sbr.rel (%p164_p2) target bundleno = 800 (0x320), region = 36  ;;  %p190_p3 = scmp.lt.s32.totalorder (!%p164_p2), %s1867_s19, 127  ;;  %2088 = vmatprep.subr.bf16.mxu0 (!%p164_p2), %v2324_v0  ;;  %2314 = vmatprep.subr.bf16.mxu1 (!%p164_p2), %v2324_v0  ;;  %v2357_v1 = vld [vmem:[%s2849_s2] sm:$0xff] (!%p164_p2)   ;;  %v2360_v18 = vld [vmem:[%s2849_s2 + $0x18] sm:$0xff] (!%p164_p2)   ;;  %v2362_v24 = vld [vmem:[%s2849_s2 + $0x28] sm:$0xff] (!%p164_p2)  }
   0x7   : > { %2089 = vmatpush3.bf16.msra.mxu0 (!%p164_p2), %v2324_v0  ;;  %2315 = vmatpush3.bf16.msra.mxu1 (!%p164_p2), %v2324_v0  ;;  %v2361_v19 = vld [vmem:[%s2849_s2 + $0x20] sm:$0xff] (!%p164_p2)   ;;  %v2363_v25 = vld [vmem:[%s2849_s2 + $0x30] sm:$0xff] (!%p164_p2)   ;;  %v2364_v40 = vld [vmem:[%s2849_s2 + $0x38] sm:$0xff] (!%p164_p2)  }
   0x8   : > { %2154 = vmatprep.subr.bf16.mxu1 (!%p164_p2), %v2357_v1  ;;  %v2516_v41 = vld [vmem:[%s2850_s3] ss:$0 sm:$0xff] (!%p164_p2)  ;;  %v2366_v50 = vld [vmem:[%s2849_s2 + $0x48] sm:$0xff] (!%p164_p2)   ;;  %v2367_v57 = vld [vmem:[%s2849_s2 + $0x50] sm:$0xff] (!%p164_p2)  }
   0x9   : > { %v2365_v49 = vld [vmem:[%s2849_s2 + $0x40] sm:$0xff] (!%p164_p2)  }
   0xa   : > { %2234 = vmatprep.subr.bf16.mxu0 (!%p164_p2), %v2365_v49 }
   0xd   : > { %s2853_s19 = smov (!%p190_p3, %s1867_s19), 127 }
   0xe   : > { %s1868_s22 = sshll.u32 %s2853_s19, 2  ;;  %s1870_s10 = sshll.u32 %s2853_s19, 3 }
   0xf   : > { %s2426_s25 = scalar_lea.vmem %s2847_s0, %s1868_s22  ;;  %s2714_s16 = scalar_lea.vmem %s2851_s4, %s1870_s10 }
  0x10   : > { %v2325_v2 = vld [vmem:[%s2426_s25] sm:$0xff]   ;;  %v2326_v3 = vld [vmem:[%s2426_s25 + $0x8] sm:$0xff]   ;;  %v2327_v4 = vld [vmem:[%s2426_s25 + $0x10] sm:$0xff]  }
  0x11   : > { %2090 = vmatprep.mubr.msk.bf16.mxu0 %vm441_vm0, %v2325_v2  ;;  %v2328_v5 = vld [vmem:[%s2426_s25 + $0x18] sm:$0xff]   ;;  %v2329_v6 = vld [vmem:[%s2426_s25 + $0x20] sm:$0xff]   ;;  %v2330_v7 = vld [vmem:[%s2426_s25 + $0x28] sm:$0xff]  }
  0x12   : > { %2091 = vmatmul.mubr.msk.bf16.vlgmr.msra.gmra.mrb[0].mxu0 %vm441_vm0, %v2326_v3  ;;  %v2331_v8 = vld [vmem:[%s2426_s25 + $0x30] sm:$0xff]   ;;  %v2341_v9 = vld [vmem:[%s2426_s25 + $0x80] sm:$0xff]   ;;  %v2342_v11 = vld [vmem:[%s2426_s25 + $0x88] sm:$0xff]  }
  0x13   : > { %2094 = vmatprep.mubr.msk.bf16.mxu0 %vm441_vm0, %v2327_v4  ;;  %2122 = vmatprep.mubr.msk.bf16.mxu1 %vm441_vm0, %v2341_v9  ;;  %v2343_v12 = vld [vmem:[%s2426_s25 + $0x90] sm:$0xff]   ;;  %v2332_v14 = vld [vmem:[%s2426_s25 + $0x38] sm:$0xff]   ;;  %v2333_v15 = vld [vmem:[%s2426_s25 + $0x40] sm:$0xff]  }
  0x14   : > { %2123 = vmatmul.mubr.msk.bf16.vlgmr.msra.gmra.mrb[0].mxu1 %vm441_vm0, %v2342_v11  ;;  %v2344_v16 = vld [vmem:[%s2426_s25 + $0x98] sm:$0xff]   ;;  %v2345_v17 = vld [vmem:[%s2426_s25 + $0xa0] sm:$0xff]   ;;  %v2334_v20 = vld [vmem:[%s2426_s25 + $0x48] sm:$0xff]   ;;  %2235 = vmatpush3.bf16.msra.mxu0 %v2365_v49 }
  0x15   : > { %2126 = vmatprep.mubr.msk.bf16.mxu1 %vm441_vm0, %v2343_v12  ;;  %2155 = vmatpush3.bf16.msra.mxu1 %v2357_v1  ;;  %v2335_v21 = vld [vmem:[%s2426_s25 + $0x50] sm:$0xff]   ;;  %v2346_v22 = vld [vmem:[%s2426_s25 + $0xa8] sm:$0xff]   ;;  %v2336_v26 = vld [vmem:[%s2426_s25 + $0x58] sm:$0xff]  }
  0x16   : > { %2156 = vmatprep.subr.bf16.mxu1 %v2358_v10  ;;  %v2347_v23 = vld [vmem:[%s2426_s25 + $0xb0] sm:$0xff]   ;;  %v2348_v27 = vld [vmem:[%s2426_s25 + $0xb8] sm:$0xff]   ;;  %v2337_v28 = vld [vmem:[%s2426_s25 + $0x60] sm:$0xff]   ;;  %2236 = vmatprep.subr.bf16.mxu0 %v2366_v50 }
  0x17   : > { %v2349_v29 = vld [vmem:[%s2426_s25 + $0xc0] sm:$0xff]   ;;  %v2338_v30 = vld [vmem:[%s2426_s25 + $0x68] sm:$0xff]   ;;  %v2339_v32 = vld [vmem:[%s2426_s25 + $0x70] sm:$0xff]  }
  0x18   : > { %v2350_v31 = vld [vmem:[%s2426_s25 + $0xc8] sm:$0xff]   ;;  %v2351_v33 = vld [vmem:[%s2426_s25 + $0xd0] sm:$0xff]   ;;  %v2340_v34 = vld [vmem:[%s2426_s25 + $0x78] sm:$0xff]   ;;  %2237 = vmatpush3.bf16.msra.mxu0 %v2366_v50 }
  0x19   : > { %2157 = vmatpush3.bf16.msra.mxu1 %v2358_v10  ;;  %v2352_v35 = vld [vmem:[%s2426_s25 + $0xd8] sm:$0xff]   ;;  %v2353_v36 = vld [vmem:[%s2426_s25 + $0xe0] sm:$0xff]   ;;  %v2354_v37 = vld [vmem:[%s2426_s25 + $0xe8] sm:$0xff]   ;;  %2238 = vmatprep.subr.bf16.mxu0 %v2367_v57 }
  0x1a   : > { %2095 = vmatmul.mubr.msk.bf16.gmra.mrb[4].mxu0 %vm441_vm0, %v2328_v5  ;;  %2158 = vmatprep.subr.bf16.mxu1 %v2359_v13  ;;  %v2355_v38 = vld [vmem:[%s2426_s25 + $0xf0] sm:$0xff]   ;;  %v2356_v39 = vld [vmem:[%s2426_s25 + $0xf8] sm:$0xff]   ;;  %v2369_v9 = vld [vmem:[%s2849_s2 + $0x60] sm:$0xff]  }
  0x1b   : > { %2098 = vmatprep.mubr.msk.bf16.mxu0 %vm441_vm0, %v2329_v6  ;;  %v2368_v2 = vld [vmem:[%s2849_s2 + $0x58] sm:$0xff]  }
  0x1c   : > { %2127 = vmatmul.mubr.msk.bf16.gmra.mrb[4].mxu1 %vm441_vm0, %v2344_v16  ;;  %2239 = vmatpush3.bf16.msra.mxu0 %v2367_v57 }
  0x1d   : > { %2130 = vmatprep.mubr.msk.bf16.mxu1 %vm441_vm0, %v2345_v17  ;;  %2159 = vmatpush3.bf16.msra.mxu1 %v2359_v13 }
  0x1e   : > { %2160 = vmatprep.subr.bf16.mxu1 %v2360_v18  ;;  %2240 = vmatprep.subr.bf16.mxu0 %v2368_v2 }
  0x20   : > { %2241 = vmatpush3.bf16.msra.mxu0 %v2368_v2 }
  0x21   : > { %2161 = vmatpush3.bf16.msra.mxu1 %v2360_v18  ;;  %2242 = vmatprep.subr.bf16.mxu0 %v2369_v9 }
  0x22   : > { %2099 = vmatmul.mubr.msk.bf16.gmra.mrb[8].mxu0 %vm441_vm0, %v2330_v7  ;;  %2162 = vmatprep.subr.bf16.mxu1 %v2361_v19 }
  0x23   : > { %2102 = vmatprep.mubr.msk.bf16.mxu0 %vm441_vm0, %v2331_v8 }
  0x24   : > { %2131 = vmatmul.mubr.msk.bf16.gmra.mrb[8].mxu1 %vm441_vm0, %v2346_v22  ;;  %2243 = vmatpush3.bf16.msra.mxu0 %v2369_v9 }
  0x25   : > { %2134 = vmatprep.mubr.msk.bf16.mxu1 %vm441_vm0, %v2347_v23  ;;  %2163 = vmatpush3.bf16.msra.mxu1 %v2361_v19 }
  0x26   : > { %2164 = vmatprep.subr.bf16.mxu1 %v2362_v24 }
  0x29   : > { %2165 = vmatpush3.bf16.msra.mxu1 %v2362_v24 }
  0x2a   : > { %2103 = vmatmul.mubr.msk.bf16.gmra.mrb[12].mxu0 %vm441_vm0, %v2332_v14  ;;  %2166 = vmatprep.subr.bf16.mxu1 %v2363_v25 }
  0x2b   : > { %2106 = vmatprep.mubr.msk.bf16.mxu0 %vm441_vm0, %v2333_v15 }
  0x2c   : > { %2135 = vmatmul.mubr.msk.bf16.gmra.mrb[12].mxu1 %vm441_vm0, %v2348_v27 }
  0x2d   : > { %2138 = vmatprep.mubr.msk.bf16.mxu1 %vm441_vm0, %v2349_v29  ;;  %2167 = vmatpush3.bf16.msra.mxu1 %v2363_v25 }
  0x2e   : > { %2168 = vmatprep.subr.bf16.mxu1 %v2364_v40 }
  0x31   : > { %2169 = vmatpush3.bf16.msra.mxu1 %v2364_v40 }
  0x32   : > { %2107 = vmatmul.mubr.msk.bf16.gmra.mrb[16].mxu0 %vm441_vm0, %v2334_v20 }
  0x33   : > { %2110 = vmatprep.mubr.msk.bf16.mxu0 %vm441_vm0, %v2335_v21 }
  0x34   : > { %2139 = vmatmul.mubr.msk.bf16.gmra.mrb[16].mxu1 %vm441_vm0, %v2350_v31 }
  0x35   : > { %2142 = vmatprep.mubr.msk.bf16.mxu1 %vm441_vm0, %v2351_v33 }
  0x3a   : > { %2111 = vmatmul.mubr.msk.bf16.gmra.mrb[20].mxu0 %vm441_vm0, %v2336_v26  ;;  %v2370_v26 = vld [vmem:[%s2849_s2 + $0x68] sm:$0xff]  }
  0x3b   : > { %2114 = vmatprep.mubr.msk.bf16.mxu0 %vm441_vm0, %v2337_v28  ;;  %2244 = vmatprep.subr.bf16.mxu0 %v2370_v26 }
  0x3c   : > { %2143 = vmatmul.mubr.msk.bf16.gmra.mrb[20].mxu1 %vm441_vm0, %v2352_v35  ;;  %2245 = vmatpush3.bf16.msra.mxu0 %v2370_v26 }
  0x3d   : > { %2146 = vmatprep.mubr.msk.bf16.mxu1 %vm441_vm0, %v2353_v36 }
  0x42   : > { %2115 = vmatmul.mubr.msk.bf16.gmra.mrb[24].mxu0 %vm441_vm0, %v2338_v30 }
  0x43   : > { %2118 = vmatprep.mubr.msk.bf16.mxu0 %vm441_vm0, %v2339_v32 }
  0x44   : > { %2147 = vmatmul.mubr.msk.bf16.gmra.mrb[24].mxu1 %vm441_vm0, %v2354_v37 }
  0x45   : > { %2150 = vmatprep.mubr.msk.bf16.mxu1 %vm441_vm0, %v2355_v38  ;;  %v2371_v38 = vld [vmem:[%s2849_s2 + $0x70] sm:$0xff]  }
  0x46   : > { %2246 = vmatprep.subr.bf16.mxu0 %v2371_v38 }
  0x47   : > { %2247 = vmatpush3.bf16.msra.mxu0 %v2371_v38 }
  0x4a   : > { %2119 = vmatmul.mubr.msk.bf16.gmra.mrb[28].mxu0 %vm441_vm0, %v2340_v34 }
  0x4c   : > { %2151 = vmatmul.mubr.msk.bf16.gmra.mrb[28].mxu1 %vm441_vm0, %v2356_v39 }
  0xe5   : > { %v2092_v42 = vpop.f32.mrb[0].mxu0 }
  0xe6   : > { %v581_v43 = vadd.f32 %v2092_v42, %v2516_v41  ;;  %v572_v44 = vpop.f32.mrb[1].mxu0 }
  0xe7   : > { %v573_v45 = vadd.f32 %v2516_v41, %v572_v44  ;;  %v2093_v46 = vpop.f32.mrb[2].mxu0  ;;  %v2124_v12 = vpop.f32.mrb[0].mxu1 }
  0xe8   : > { %v584_v47 = vadd.f32 %v2093_v46, %v2516_v41  ;;  %v575_v48 = vpop.f32.mrb[3].mxu0  ;;  %v829_v52 = vmax.f32 %v581_v43, 0.0  ;;  %v709_v15 = vadd.f32 %v2124_v12, %v2516_v41  ;;  %v700_v16 = vpop.f32.mrb[1].mxu1 }
  0xe9   : > { %v576_v51 = vadd.f32 %v2516_v41, %v575_v48  ;;  %v827_v54 = vmax.f32 %v573_v45, 0.0  ;;  %v701_v19 = vadd.f32 %v2516_v41, %v700_v16  ;;  %v2125_v20 = vpop.f32.mrb[2].mxu1 }
  0xea   : > { %v830_v53 = vmax.f32 %v584_v47, 0.0  ;;  %v861_v23 = vmax.f32 %v709_v15, 0.0  ;;  %v712_v24 = vadd.f32 %v2125_v20, %v2516_v41  ;;  %v703_v25 = vpop.f32.mrb[3].mxu1 }
  0xeb   : > { %v828_v55 = vmax.f32 %v576_v51, 0.0  ;;  %v859_v28 = vmax.f32 %v701_v19, 0.0  ;;  %v704_v29 = vadd.f32 %v2516_v41, %v703_v25 }
  0xec   : > { %v892_v56 = vpack.c.bf16 %v830_v53, %v829_v52  ;;  %v862_v32 = vmax.f32 %v712_v24, 0.0 }
  0xed   : > { %v891_v58 = vpack.c.bf16 %v828_v55, %v827_v54  ;;  %v2096_v59 = vpop.f32.mrb[4].mxu0  ;;  %v860_v35 = vmax.f32 %v704_v29, 0.0 }
  0xee   : > { %v597_v60 = vadd.f32 %v2096_v59, %v2516_v41  ;;  %v588_v61 = vpop.f32.mrb[5].mxu0  ;;  %v2552_v37 = vpack.c.bf16 %v862_v32, %v861_v23 }
  0xef   : > { %v589_v62 = vadd.f32 %v2516_v41, %v588_v61  ;;  %v2097_v63 = vpop.f32.mrb[6].mxu0  ;;  %2170 = vmatprep.mubr.bf16.mxu1 %v891_v58  ;;  %v2557_v42 = vpack.c.bf16 %v860_v35, %v859_v28  ;;  %v2128_v43 = vpop.f32.mrb[4].mxu1 }
  0xf0   : > { %v600_v0 = vadd.f32 %v2097_v63, %v2516_v41  ;;  %v591_v1 = vpop.f32.mrb[7].mxu0  ;;  %2171 = vmatmul.mubr.bf16.vlgmr.msra.gmra.mrb[32].mxu1 %v892_v56  ;;  %v833_v4 = vmax.f32 %v597_v60, 0.0  ;;  %v725_v46 = vadd.f32 %v2128_v43, %v2516_v41  ;;  %v716_v47 = vpop.f32.mrb[5].mxu1 }
  0xf1   : > { %v592_v3 = vadd.f32 %v2516_v41, %v591_v1  ;;  %v831_v6 = vmax.f32 %v589_v62, 0.0  ;;  %v717_v50 = vadd.f32 %v2516_v41, %v716_v47  ;;  %v2129_v51 = vpop.f32.mrb[6].mxu1 }
  0xf2   : > { %v834_v5 = vmax.f32 %v600_v0, 0.0  ;;  %v865_v54 = vmax.f32 %v725_v46, 0.0  ;;  %v728_v55 = vadd.f32 %v2129_v51, %v2516_v41  ;;  %v719_v56 = vpop.f32.mrb[7].mxu1 }
  0xf3   : > { %v832_v7 = vmax.f32 %v592_v3, 0.0  ;;  %v863_v58 = vmax.f32 %v717_v50, 0.0  ;;  %v720_v59 = vadd.f32 %v2516_v41, %v719_v56 }
  0xf4   : > { %v894_v8 = vpack.c.bf16 %v834_v5, %v833_v4  ;;  %v866_v62 = vmax.f32 %v728_v55, 0.0 }
  0xf5   : > { %v893_v10 = vpack.c.bf16 %v832_v7, %v831_v6  ;;  %v2100_v11 = vpop.f32.mrb[8].mxu0  ;;  %v864_v1 = vmax.f32 %v720_v59, 0.0 }
  0xf6   : > { %v613_v13 = vadd.f32 %v2100_v11, %v2516_v41  ;;  %v604_v14 = vpop.f32.mrb[9].mxu0  ;;  %v2567_v3 = vpack.c.bf16 %v866_v62, %v865_v54 }
  0xf7   : > { %v605_v17 = vadd.f32 %v2516_v41, %v604_v14  ;;  %v2101_v18 = vpop.f32.mrb[10].mxu0  ;;  %2174 = vmatprep.mubr.bf16.mxu1 %v893_v10  ;;  %v2569_v6 = vpack.c.bf16 %v864_v1, %v863_v58  ;;  %v2132_v7 = vpop.f32.mrb[8].mxu1 }
  0xf8   : > { %v616_v21 = vadd.f32 %v2101_v18, %v2516_v41  ;;  %v607_v22 = vpop.f32.mrb[11].mxu0  ;;  %2175 = vmatmul.mubr.bf16.gmra.mrb[36].mxu1 %v894_v8  ;;  %v837_v30 = vmax.f32 %v613_v13, 0.0  ;;  %v741_v10 = vadd.f32 %v2132_v7, %v2516_v41  ;;  %v732_v11 = vpop.f32.mrb[9].mxu1 }
  0xf9   : > { %v608_v27 = vadd.f32 %v2516_v41, %v607_v22  ;;  %v835_v33 = vmax.f32 %v605_v17, 0.0  ;;  %v733_v14 = vadd.f32 %v2516_v41, %v732_v11  ;;  %v2133_v15 = vpop.f32.mrb[10].mxu1 }
  0xfa   : > { %v838_v31 = vmax.f32 %v616_v21, 0.0  ;;  %v869_v18 = vmax.f32 %v741_v10, 0.0  ;;  %v744_v19 = vadd.f32 %v2133_v15, %v2516_v41  ;;  %v735_v20 = vpop.f32.mrb[11].mxu1 }
  0xfb   : > { %v836_v34 = vmax.f32 %v608_v27, 0.0  ;;  %v867_v22 = vmax.f32 %v733_v14, 0.0  ;;  %v736_v23 = vadd.f32 %v2516_v41, %v735_v20 }
  0xfc   : > { %v896_v36 = vpack.c.bf16 %v838_v31, %v837_v30  ;;  %v870_v26 = vmax.f32 %v744_v19, 0.0 }
  0xfd   : > { %v895_v39 = vpack.c.bf16 %v836_v34, %v835_v33  ;;  %v2104_v40 = vpop.f32.mrb[12].mxu0  ;;  %v868_v29 = vmax.f32 %v736_v23, 0.0 }
  0xfe   : > { %v629_v44 = vadd.f32 %v2104_v40, %v2516_v41  ;;  %v620_v45 = vpop.f32.mrb[13].mxu0  ;;  %v2579_v31 = vpack.c.bf16 %v870_v26, %v869_v18 }
  0xff   : > { %v621_v48 = vadd.f32 %v2516_v41, %v620_v45  ;;  %v2105_v49 = vpop.f32.mrb[14].mxu0  ;;  %2178 = vmatprep.mubr.bf16.mxu1 %v895_v39  ;;  %v2581_v34 = vpack.c.bf16 %v868_v29, %v867_v22  ;;  %v2136_v35 = vpop.f32.mrb[12].mxu1 }
 0x100   : > { %v632_v52 = vadd.f32 %v2105_v49, %v2516_v41  ;;  %v623_v53 = vpop.f32.mrb[15].mxu0  ;;  %2179 = vmatmul.mubr.bf16.gmra.mrb[40].mxu1 %v896_v36  ;;  %v841_v60 = vmax.f32 %v629_v44, 0.0  ;;  %v757_v39 = vadd.f32 %v2136_v35, %v2516_v41  ;;  %v748_v40 = vpop.f32.mrb[13].mxu1 }
 0x101   : > { %v624_v57 = vadd.f32 %v2516_v41, %v623_v53  ;;  %v839_v63 = vmax.f32 %v621_v48, 0.0  ;;  %v749_v45 = vadd.f32 %v2516_v41, %v748_v40  ;;  %v2137_v46 = vpop.f32.mrb[14].mxu1 }
 0x102   : > { %v842_v61 = vmax.f32 %v632_v52, 0.0  ;;  %v873_v49 = vmax.f32 %v757_v39, 0.0  ;;  %v760_v50 = vadd.f32 %v2137_v46, %v2516_v41  ;;  %v751_v51 = vpop.f32.mrb[15].mxu1 }
 0x103   : > { %v840_v0 = vmax.f32 %v624_v57, 0.0  ;;  %v871_v53 = vmax.f32 %v749_v45, 0.0  ;;  %v752_v54 = vadd.f32 %v2516_v41, %v751_v51 }
 0x104   : > { %v898_v2 = vpack.c.bf16 %v842_v61, %v841_v60  ;;  %v874_v57 = vmax.f32 %v760_v50, 0.0 }
 0x105   : > { %v897_v4 = vpack.c.bf16 %v840_v0, %v839_v63  ;;  %v2108_v5 = vpop.f32.mrb[16].mxu0  ;;  %v872_v60 = vmax.f32 %v752_v54, 0.0 }
 0x106   : > { %v645_v8 = vadd.f32 %v2108_v5, %v2516_v41  ;;  %v636_v9 = vpop.f32.mrb[17].mxu0  ;;  %v2591_v62 = vpack.c.bf16 %v874_v57, %v873_v49 }
 0x107   : > { %v637_v12 = vadd.f32 %v2516_v41, %v636_v9  ;;  %v2109_v13 = vpop.f32.mrb[18].mxu0  ;;  %2182 = vmatprep.mubr.bf16.mxu1 %v897_v4  ;;  %v2593_v1 = vpack.c.bf16 %v872_v60, %v871_v53 }
 0x108   : > { %v648_v16 = vadd.f32 %v2109_v13, %v2516_v41  ;;  %v639_v17 = vpop.f32.mrb[19].mxu0  ;;  %2183 = vmatmul.mubr.bf16.gmra.mrb[44].mxu1 %v898_v2  ;;  %v845_v24 = vmax.f32 %v645_v8, 0.0  ;;  %v2140_v2 = vpop.f32.mrb[16].mxu1 }
 0x109   : > { %v640_v21 = vadd.f32 %v2516_v41, %v639_v17  ;;  %v843_v27 = vmax.f32 %v637_v12, 0.0  ;;  %v773_v7 = vadd.f32 %v2140_v2, %v2516_v41  ;;  %v764_v8 = vpop.f32.mrb[17].mxu1 }
 0x10a   : > { %v846_v25 = vmax.f32 %v648_v16, 0.0  ;;  %v765_v11 = vadd.f32 %v2516_v41, %v764_v8  ;;  %v2141_v12 = vpop.f32.mrb[18].mxu1 }
 0x10b   : > { %v844_v28 = vmax.f32 %v640_v21, 0.0  ;;  %v877_v15 = vmax.f32 %v773_v7, 0.0  ;;  %v776_v16 = vadd.f32 %v2141_v12, %v2516_v41  ;;  %v767_v17 = vpop.f32.mrb[19].mxu1 }
 0x10c   : > { %v900_v30 = vpack.c.bf16 %v846_v25, %v845_v24  ;;  %v875_v19 = vmax.f32 %v765_v11, 0.0  ;;  %v768_v20 = vadd.f32 %v2516_v41, %v767_v17 }
 0x10d   : > { %v899_v32 = vpack.c.bf16 %v844_v28, %v843_v27  ;;  %v2112_v33 = vpop.f32.mrb[20].mxu0  ;;  %v878_v23 = vmax.f32 %v776_v16, 0.0 }
 0x10e   : > { %v661_v36 = vadd.f32 %v2112_v33, %v2516_v41  ;;  %v652_v38 = vpop.f32.mrb[21].mxu0  ;;  %v876_v26 = vmax.f32 %v768_v20, 0.0 }
 0x10f   : > { %v653_v43 = vadd.f32 %v2516_v41, %v652_v38  ;;  %v2113_v44 = vpop.f32.mrb[22].mxu0  ;;  %2186 = vmatprep.mubr.bf16.mxu1 %v899_v32  ;;  %v2603_v28 = vpack.c.bf16 %v878_v23, %v877_v15  ;;  %v2144_v33 = vpop.f32.mrb[20].mxu1 }
 0x110   : > { %v664_v47 = vadd.f32 %v2113_v44, %v2516_v41  ;;  %v655_v48 = vpop.f32.mrb[23].mxu0  ;;  %2187 = vmatmul.mubr.bf16.gmra.mrb[48].mxu1 %v900_v30  ;;  %v849_v55 = vmax.f32 %v661_v36, 0.0  ;;  %v2605_v32 = vpack.c.bf16 %v876_v26, %v875_v19  ;;  %v789_v38 = vadd.f32 %v2144_v33, %v2516_v41  ;;  %v780_v39 = vpop.f32.mrb[21].mxu1 }
 0x111   : > { %v656_v52 = vadd.f32 %v2516_v41, %v655_v48  ;;  %v847_v58 = vmax.f32 %v653_v43, 0.0  ;;  %v781_v44 = vadd.f32 %v2516_v41, %v780_v39  ;;  %v2145_v45 = vpop.f32.mrb[22].mxu1 }
 0x112   : > { %v850_v56 = vmax.f32 %v664_v47, 0.0  ;;  %v881_v48 = vmax.f32 %v789_v38, 0.0  ;;  %v792_v49 = vadd.f32 %v2145_v45, %v2516_v41  ;;  %v783_v50 = vpop.f32.mrb[23].mxu1 }
 0x113   : > { %v848_v59 = vmax.f32 %v656_v52, 0.0  ;;  %v879_v52 = vmax.f32 %v781_v44, 0.0  ;;  %v784_v53 = vadd.f32 %v2516_v41, %v783_v50 }
 0x114   : > { %v902_v61 = vpack.c.bf16 %v850_v56, %v849_v55  ;;  %v882_v56 = vmax.f32 %v792_v49, 0.0 }
 0x115   : > { %v901_v63 = vpack.c.bf16 %v848_v59, %v847_v58  ;;  %v2116_v0 = vpop.f32.mrb[24].mxu0  ;;  %v880_v59 = vmax.f32 %v784_v53, 0.0 }
 0x116   : > { %v677_v4 = vadd.f32 %v2116_v0, %v2516_v41  ;;  %v668_v5 = vpop.f32.mrb[25].mxu0 }
 0x117   : > { %v669_v9 = vadd.f32 %v2516_v41, %v668_v5  ;;  %v2117_v10 = vpop.f32.mrb[26].mxu0  ;;  %2190 = vmatprep.mubr.bf16.mxu1 %v901_v63  ;;  %v917_v0 = vpack.c.bf16 %v880_v59, %v879_v52  ;;  %v2148_v2 = vpop.f32.mrb[24].mxu1 }
 0x118   : > { %v680_v13 = vadd.f32 %v2117_v10, %v2516_v41  ;;  %v671_v14 = vpop.f32.mrb[27].mxu0  ;;  %2191 = vmatmul.mubr.bf16.gmra.mrb[52].mxu1 %v902_v61  ;;  %v853_v21 = vmax.f32 %v677_v4, 0.0  ;;  %v918_v61 = vpack.c.bf16 %v882_v56, %v881_v48  ;;  %v805_v4 = vadd.f32 %v2148_v2, %v2516_v41  ;;  %v796_v5 = vpop.f32.mrb[25].mxu1 }
 0x119   : > { %v672_v18 = vadd.f32 %v2516_v41, %v671_v14  ;;  %v851_v24 = vmax.f32 %v669_v9, 0.0  ;;  %v797_v7 = vadd.f32 %v2516_v41, %v796_v5  ;;  %v2149_v8 = vpop.f32.mrb[26].mxu1 }
 0x11a   : > { %v854_v22 = vmax.f32 %v680_v13, 0.0  ;;  %v885_v9 = vmax.f32 %v805_v4, 0.0  ;;  %v808_v10 = vadd.f32 %v2149_v8, %v2516_v41  ;;  %v799_v11 = vpop.f32.mrb[27].mxu1 }
 0x11b   : > { %v852_v25 = vmax.f32 %v672_v18, 0.0  ;;  %v883_v12 = vmax.f32 %v797_v7, 0.0  ;;  %v800_v13 = vadd.f32 %v2516_v41, %v799_v11 }
 0x11c   : > { %v904_v27 = vpack.c.bf16 %v854_v22, %v853_v21  ;;  %v886_v14 = vmax.f32 %v808_v10, 0.0 }
 0x11d   : > { %v903_v29 = vpack.c.bf16 %v852_v25, %v851_v24  ;;  %v2120_v30 = vpop.f32.mrb[28].mxu0  ;;  %v884_v15 = vmax.f32 %v800_v13, 0.0 }
 0x11e   : > { %v693_v35 = vadd.f32 %v2120_v30, %v2516_v41  ;;  %v684_v36 = vpop.f32.mrb[29].mxu0  ;;  %v920_v16 = vpack.c.bf16 %v886_v14, %v885_v9 }
 0x11f   : > { %v685_v40 = vadd.f32 %v2516_v41, %v684_v36  ;;  %v2121_v43 = vpop.f32.mrb[30].mxu0  ;;  %2194 = vmatprep.mubr.bf16.mxu1 %v903_v29  ;;  %v919_v17 = vpack.c.bf16 %v884_v15, %v883_v12  ;;  %v2152_v18 = vpop.f32.mrb[28].mxu1 }
 0x120   : > { %v696_v46 = vadd.f32 %v2121_v43, %v2516_v41  ;;  %v687_v47 = vpop.f32.mrb[31].mxu0  ;;  %2195 = vmatmul.mubr.bf16.gmra.mrb[56].mxu1 %v904_v27  ;;  %v857_v54 = vmax.f32 %v693_v35, 0.0  ;;  %v821_v19 = vadd.f32 %v2152_v18, %v2516_v41  ;;  %v812_v20 = vpop.f32.mrb[29].mxu1 }
 0x121   : > { %v688_v51 = vadd.f32 %v2516_v41, %v687_v47  ;;  %v855_v57 = vmax.f32 %v685_v40, 0.0  ;;  %v813_v21 = vadd.f32 %v2516_v41, %v812_v20  ;;  %v2153_v22 = vpop.f32.mrb[30].mxu1 }
 0x122   : > { %v858_v55 = vmax.f32 %v696_v46, 0.0  ;;  %v889_v23 = vmax.f32 %v821_v19, 0.0  ;;  %v824_v24 = vadd.f32 %v2153_v22, %v2516_v41 }
 0x123   : > { %v856_v58 = vmax.f32 %v688_v51, 0.0  ;;  %v887_v25 = vmax.f32 %v813_v21, 0.0 }
 0x124   : > { %v906_v60 = vpack.c.bf16 %v858_v55, %v857_v54  ;;  %v890_v27 = vmax.f32 %v824_v24, 0.0 }
 0x125   : > { %v905_v63 = vpack.c.bf16 %v856_v58, %v855_v57 }
 0x126   : > { %v922_v30 = vpack.c.bf16 %v890_v27, %v889_v23 }
 0x127   : > { %2198 = vmatprep.mubr.bf16.mxu1 %v905_v63 }
 0x128   : > { %2199 = vmatmul.mubr.bf16.gmra.mrb[60].mxu1 %v906_v60 }
 0x129   : > { %2202 = vmatprep.mubr.bf16.mxu1 %v2557_v42  ;;  %v815_v42 = vpop.f32.mrb[31].mxu1 }
 0x12a   : > { %v816_v26 = vadd.f32 %v2516_v41, %v815_v42  ;;  %v2639_v41 = vld [vmem:[%s2850_s3 + $0x1] ss:$0 sm:$0xff] }
 0x12c   : > { %v888_v29 = vmax.f32 %v816_v26, 0.0 }
 0x12e   : > { %v921_v33 = vpack.c.bf16 %v888_v29, %v887_v25 }
 0x130   : > { %2203 = vmatmul.mubr.bf16.gmra.mrb[64].mxu1 %v2552_v37  ;;  %v2372_v37 = vld [vmem:[%s2849_s2 + $0x78] sm:$0xff]  }
 0x131   : > { %2206 = vmatprep.mubr.bf16.mxu1 %v2569_v6  ;;  %2248 = vmatprep.subr.bf16.mxu0 %v2372_v37 }
 0x132   : > { %2249 = vmatpush3.bf16.msra.mxu0 %v2372_v37 }
 0x138   : > { %2207 = vmatmul.mubr.bf16.gmra.mrb[68].mxu1 %v2567_v3 }
 0x139   : > { %2210 = vmatprep.mubr.bf16.mxu1 %v2581_v34 }
 0x140   : > { %2211 = vmatmul.mubr.bf16.gmra.mrb[72].mxu1 %v2579_v31 }
 0x141   : > { %2214 = vmatprep.mubr.bf16.mxu1 %v2593_v1 }
 0x148   : > { %2215 = vmatmul.mubr.bf16.gmra.mrb[76].mxu1 %v2591_v62 }
 0x149   : > { %2218 = vmatprep.mubr.bf16.mxu1 %v2605_v32 }
 0x150   : > { %2219 = vmatmul.mubr.bf16.gmra.mrb[80].mxu1 %v2603_v28 }
 0x151   : > { %2222 = vmatprep.mubr.bf16.mxu1 %v917_v0 }
 0x158   : > { %2223 = vmatmul.mubr.bf16.gmra.mrb[84].mxu1 %v918_v61 }
 0x159   : > { %2226 = vmatprep.mubr.bf16.mxu1 %v919_v17 }
 0x160   : > { %2227 = vmatmul.mubr.bf16.gmra.mrb[88].mxu1 %v920_v16 }
 0x161   : > { %2230 = vmatprep.mubr.bf16.mxu1 %v921_v33 }
 0x168   : > { %2231 = vmatmul.mubr.bf16.gmra.mrb[92].mxu1 %v922_v30 }
 0x1c3   : > { %v2172_v3 = vpop.f32.mrb[32].mxu1 }
 0x1c4   : > { %v1038_v6 = vadd.f32 %v2172_v3, %v2639_v41  ;;  %v1029_v31 = vpop.f32.mrb[33].mxu1 }
 0x1c5   : > { %v1030_v34 = vadd.f32 %v2639_v41, %v1029_v31  ;;  %v2173_v62 = vpop.f32.mrb[34].mxu1 }
 0x1c6   : > { %v1041_v1 = vadd.f32 %v2173_v62, %v2639_v41  ;;  %v1032_v28 = vpop.f32.mrb[35].mxu1  ;;  %v1286_v35 = vmax.f32 %v1038_v6, 0.0 }
 0x1c7   : > { %v1033_v32 = vadd.f32 %v2639_v41, %v1032_v28  ;;  %v1284_v38 = vmax.f32 %v1030_v34, 0.0 }
 0x1c8   : > { %v1287_v36 = vmax.f32 %v1041_v1, 0.0 }
 0x1c9   : > { %v1285_v39 = vmax.f32 %v1033_v32, 0.0 }
 0x1ca   : > { %v1349_v40 = vpack.c.bf16 %v1287_v36, %v1286_v35 }
 0x1cb   : > { %v1348_v43 = vpack.c.bf16 %v1285_v39, %v1284_v38  ;;  %v2176_v44 = vpop.f32.mrb[36].mxu1 }
 0x1cc   : > { %v1054_v45 = vadd.f32 %v2176_v44, %v2639_v41  ;;  %v1045_v46 = vpop.f32.mrb[37].mxu1 }
 0x1cd   : > { %v1046_v47 = vadd.f32 %v2639_v41, %v1045_v46  ;;  %v2177_v48 = vpop.f32.mrb[38].mxu1  ;;  %2250 = vmatprep.mubr.bf16.mxu0 %v1348_v43 }
 0x1ce   : > { %v1057_v49 = vadd.f32 %v2177_v48, %v2639_v41  ;;  %v1048_v50 = vpop.f32.mrb[39].mxu1  ;;  %2251 = vmatmul.mubr.bf16.vlgmr.msra.gmra.mrb[32].mxu0 %v1349_v40  ;;  %v1290_v52 = vmax.f32 %v1054_v45, 0.0 }
 0x1cf   : > { %v1049_v51 = vadd.f32 %v2639_v41, %v1048_v50  ;;  %v1288_v54 = vmax.f32 %v1046_v47, 0.0 }
 0x1d0   : > { %v1291_v53 = vmax.f32 %v1057_v49, 0.0 }
 0x1d1   : > { %v1289_v55 = vmax.f32 %v1049_v51, 0.0 }
 0x1d2   : > { %v1351_v56 = vpack.c.bf16 %v1291_v53, %v1290_v52 }
 0x1d3   : > { %v1350_v57 = vpack.c.bf16 %v1289_v55, %v1288_v54  ;;  %v2180_v58 = vpop.f32.mrb[40].mxu1 }
 0x1d4   : > { %v1070_v59 = vadd.f32 %v2180_v58, %v2639_v41  ;;  %v1061_v60 = vpop.f32.mrb[41].mxu1 }
 0x1d5   : > { %v1062_v61 = vadd.f32 %v2639_v41, %v1061_v60  ;;  %v2181_v63 = vpop.f32.mrb[42].mxu1  ;;  %2254 = vmatprep.mubr.bf16.mxu0 %v1350_v57 }
 0x1d6   : > { %v1073_v0 = vadd.f32 %v2181_v63, %v2639_v41  ;;  %v1064_v2 = vpop.f32.mrb[43].mxu1  ;;  %2255 = vmatmul.mubr.bf16.gmra.mrb[36].mxu0 %v1351_v56  ;;  %v1294_v5 = vmax.f32 %v1070_v59, 0.0 }
 0x1d7   : > { %v1065_v4 = vadd.f32 %v2639_v41, %v1064_v2  ;;  %v1292_v8 = vmax.f32 %v1062_v61, 0.0 }
 0x1d8   : > { %v1295_v7 = vmax.f32 %v1073_v0, 0.0 }
 0x1d9   : > { %v1293_v9 = vmax.f32 %v1065_v4, 0.0 }
 0x1da   : > { %v1353_v10 = vpack.c.bf16 %v1295_v7, %v1294_v5 }
 0x1db   : > { %v1352_v11 = vpack.c.bf16 %v1293_v9, %v1292_v8  ;;  %v2184_v12 = vpop.f32.mrb[44].mxu1 }
 0x1dc   : > { %v1086_v13 = vadd.f32 %v2184_v12, %v2639_v41  ;;  %v1077_v14 = vpop.f32.mrb[45].mxu1 }
 0x1dd   : > { %v1078_v15 = vadd.f32 %v2639_v41, %v1077_v14  ;;  %v2185_v16 = vpop.f32.mrb[46].mxu1  ;;  %2258 = vmatprep.mubr.bf16.mxu0 %v1352_v11 }
 0x1de   : > { %v1089_v17 = vadd.f32 %v2185_v16, %v2639_v41  ;;  %v1080_v18 = vpop.f32.mrb[47].mxu1  ;;  %2259 = vmatmul.mubr.bf16.gmra.mrb[40].mxu0 %v1353_v10  ;;  %v1298_v20 = vmax.f32 %v1086_v13, 0.0 }
 0x1df   : > { %v1081_v19 = vadd.f32 %v2639_v41, %v1080_v18  ;;  %v1296_v22 = vmax.f32 %v1078_v15, 0.0 }
 0x1e0   : > { %v1299_v21 = vmax.f32 %v1089_v17, 0.0 }
 0x1e1   : > { %v1297_v23 = vmax.f32 %v1081_v19, 0.0 }
 0x1e2   : > { %v1355_v24 = vpack.c.bf16 %v1299_v21, %v1298_v20 }
 0x1e3   : > { %v1354_v42 = vpack.c.bf16 %v1297_v23, %v1296_v22  ;;  %v2188_v25 = vpop.f32.mrb[48].mxu1 }
 0x1e4   : > { %v1102_v26 = vadd.f32 %v2188_v25, %v2639_v41  ;;  %v1093_v27 = vpop.f32.mrb[49].mxu1 }
 0x1e5   : > { %v1094_v29 = vadd.f32 %v2639_v41, %v1093_v27  ;;  %v2189_v30 = vpop.f32.mrb[50].mxu1  ;;  %2262 = vmatprep.mubr.bf16.mxu0 %v1354_v42 }
 0x1e6   : > { %v1105_v33 = vadd.f32 %v2189_v30, %v2639_v41  ;;  %v1096_v37 = vpop.f32.mrb[51].mxu1  ;;  %2263 = vmatmul.mubr.bf16.gmra.mrb[44].mxu0 %v1355_v24  ;;  %v1302_v6 = vmax.f32 %v1102_v26, 0.0 }
 0x1e7   : > { %v1097_v3 = vadd.f32 %v2639_v41, %v1096_v37  ;;  %v1300_v34 = vmax.f32 %v1094_v29, 0.0 }
 0x1e8   : > { %v1303_v31 = vmax.f32 %v1105_v33, 0.0 }
 0x1e9   : > { %v1301_v62 = vmax.f32 %v1097_v3, 0.0 }
 0x1ea   : > { %v1357_v1 = vpack.c.bf16 %v1303_v31, %v1302_v6 }
 0x1eb   : > { %v1356_v28 = vpack.c.bf16 %v1301_v62, %v1300_v34  ;;  %v2192_v32 = vpop.f32.mrb[52].mxu1 }
 0x1ec   : > { %v1118_v35 = vadd.f32 %v2192_v32, %v2639_v41  ;;  %v1109_v36 = vpop.f32.mrb[53].mxu1 }
 0x1ed   : > { %v1110_v38 = vadd.f32 %v2639_v41, %v1109_v36  ;;  %v2193_v39 = vpop.f32.mrb[54].mxu1  ;;  %2266 = vmatprep.mubr.bf16.mxu0 %v1356_v28 }
 0x1ee   : > { %v1121_v40 = vadd.f32 %v2193_v39, %v2639_v41  ;;  %v1112_v43 = vpop.f32.mrb[55].mxu1  ;;  %2267 = vmatmul.mubr.bf16.gmra.mrb[48].mxu0 %v1357_v1  ;;  %v1306_v45 = vmax.f32 %v1118_v35, 0.0 }
 0x1ef   : > { %v1113_v44 = vadd.f32 %v2639_v41, %v1112_v43  ;;  %v1304_v47 = vmax.f32 %v1110_v38, 0.0 }
 0x1f0   : > { %v1307_v46 = vmax.f32 %v1121_v40, 0.0 }
 0x1f1   : > { %v1305_v48 = vmax.f32 %v1113_v44, 0.0 }
 0x1f2   : > { %v1359_v49 = vpack.c.bf16 %v1307_v46, %v1306_v45 }
 0x1f3   : > { %v1358_v50 = vpack.c.bf16 %v1305_v48, %v1304_v47  ;;  %v2196_v51 = vpop.f32.mrb[56].mxu1 }
 0x1f4   : > { %v1134_v52 = vadd.f32 %v2196_v51, %v2639_v41  ;;  %v1125_v53 = vpop.f32.mrb[57].mxu1 }
 0x1f5   : > { %v1126_v54 = vadd.f32 %v2639_v41, %v1125_v53  ;;  %v2197_v55 = vpop.f32.mrb[58].mxu1  ;;  %2270 = vmatprep.mubr.bf16.mxu0 %v1358_v50 }
 0x1f6   : > { %v1137_v56 = vadd.f32 %v2197_v55, %v2639_v41  ;;  %v1128_v57 = vpop.f32.mrb[59].mxu1  ;;  %2271 = vmatmul.mubr.bf16.gmra.mrb[52].mxu0 %v1359_v49  ;;  %v1310_v59 = vmax.f32 %v1134_v52, 0.0 }
 0x1f7   : > { %v1129_v58 = vadd.f32 %v2639_v41, %v1128_v57  ;;  %v1308_v61 = vmax.f32 %v1126_v54, 0.0 }
 0x1f8   : > { %v1311_v60 = vmax.f32 %v1137_v56, 0.0 }
 0x1f9   : > { %v1309_v63 = vmax.f32 %v1129_v58, 0.0 }
 0x1fa   : > { %v1361_v0 = vpack.c.bf16 %v1311_v60, %v1310_v59 }
 0x1fb   : > { %v1360_v2 = vpack.c.bf16 %v1309_v63, %v1308_v61  ;;  %v2200_v4 = vpop.f32.mrb[60].mxu1 }
 0x1fc   : > { %v1150_v5 = vadd.f32 %v2200_v4, %v2639_v41  ;;  %v1141_v7 = vpop.f32.mrb[61].mxu1 }
 0x1fd   : > { %v1142_v8 = vadd.f32 %v2639_v41, %v1141_v7  ;;  %v2201_v9 = vpop.f32.mrb[62].mxu1  ;;  %2274 = vmatprep.mubr.bf16.mxu0 %v1360_v2 }
 0x1fe   : > { %v1153_v10 = vadd.f32 %v2201_v9, %v2639_v41  ;;  %v1144_v11 = vpop.f32.mrb[63].mxu1  ;;  %2275 = vmatmul.mubr.bf16.gmra.mrb[56].mxu0 %v1361_v0  ;;  %v1314_v13 = vmax.f32 %v1150_v5, 0.0 }
 0x1ff   : > { %v1145_v12 = vadd.f32 %v2639_v41, %v1144_v11  ;;  %v1312_v15 = vmax.f32 %v1142_v8, 0.0 }
 0x200   : > { %v1315_v14 = vmax.f32 %v1153_v10, 0.0 }
 0x201   : > { %v1313_v16 = vmax.f32 %v1145_v12, 0.0 }
 0x202   : > { %v1363_v17 = vpack.c.bf16 %v1315_v14, %v1314_v13 }
 0x203   : > { %v1362_v18 = vpack.c.bf16 %v1313_v16, %v1312_v15  ;;  %v2204_v19 = vpop.f32.mrb[64].mxu1 }
 0x204   : > { %v1166_v20 = vadd.f32 %v2204_v19, %v2639_v41  ;;  %v1157_v21 = vpop.f32.mrb[65].mxu1 }
 0x205   : > { %v1158_v22 = vadd.f32 %v2639_v41, %v1157_v21  ;;  %v2205_v23 = vpop.f32.mrb[66].mxu1  ;;  %2278 = vmatprep.mubr.bf16.mxu0 %v1362_v18 }
 0x206   : > { %v1169_v24 = vadd.f32 %v2205_v23, %v2639_v41  ;;  %v1160_v42 = vpop.f32.mrb[67].mxu1  ;;  %2279 = vmatmul.mubr.bf16.gmra.mrb[60].mxu0 %v1363_v17  ;;  %v1318_v26 = vmax.f32 %v1166_v20, 0.0 }
 0x207   : > { %v1161_v25 = vadd.f32 %v2639_v41, %v1160_v42  ;;  %v1316_v29 = vmax.f32 %v1158_v22, 0.0 }
 0x208   : > { %v1319_v27 = vmax.f32 %v1169_v24, 0.0 }
 0x209   : > { %v1317_v30 = vmax.f32 %v1161_v25, 0.0 }
 0x20a   : > { %v1365_v33 = vpack.c.bf16 %v1319_v27, %v1318_v26 }
 0x20b   : > { %v1364_v37 = vpack.c.bf16 %v1317_v30, %v1316_v29  ;;  %v2208_v3 = vpop.f32.mrb[68].mxu1 }
 0x20c   : > { %v1182_v6 = vadd.f32 %v2208_v3, %v2639_v41  ;;  %v1173_v31 = vpop.f32.mrb[69].mxu1 }
 0x20d   : > { %v1174_v34 = vadd.f32 %v2639_v41, %v1173_v31  ;;  %v2209_v62 = vpop.f32.mrb[70].mxu1  ;;  %2282 = vmatprep.mubr.bf16.mxu0 %v1364_v37 }
 0x20e   : > { %v1185_v1 = vadd.f32 %v2209_v62, %v2639_v41  ;;  %v1176_v28 = vpop.f32.mrb[71].mxu1  ;;  %2283 = vmatmul.mubr.bf16.gmra.mrb[64].mxu0 %v1365_v33  ;;  %v1322_v35 = vmax.f32 %v1182_v6, 0.0 }
 0x20f   : > { %v1177_v32 = vadd.f32 %v2639_v41, %v1176_v28  ;;  %v1320_v38 = vmax.f32 %v1174_v34, 0.0 }
 0x210   : > { %v1323_v36 = vmax.f32 %v1185_v1, 0.0 }
 0x211   : > { %v1321_v39 = vmax.f32 %v1177_v32, 0.0 }
 0x212   : > { %v1367_v40 = vpack.c.bf16 %v1323_v36, %v1322_v35 }
 0x213   : > { %v1366_v43 = vpack.c.bf16 %v1321_v39, %v1320_v38  ;;  %v2212_v44 = vpop.f32.mrb[72].mxu1 }
 0x214   : > { %v1198_v45 = vadd.f32 %v2212_v44, %v2639_v41  ;;  %v1189_v46 = vpop.f32.mrb[73].mxu1 }
 0x215   : > { %v1190_v47 = vadd.f32 %v2639_v41, %v1189_v46  ;;  %v2213_v48 = vpop.f32.mrb[74].mxu1  ;;  %2286 = vmatprep.mubr.bf16.mxu0 %v1366_v43 }
 0x216   : > { %v1201_v49 = vadd.f32 %v2213_v48, %v2639_v41  ;;  %v1192_v50 = vpop.f32.mrb[75].mxu1  ;;  %2287 = vmatmul.mubr.bf16.gmra.mrb[68].mxu0 %v1367_v40  ;;  %v1326_v52 = vmax.f32 %v1198_v45, 0.0 }
 0x217   : > { %v1193_v51 = vadd.f32 %v2639_v41, %v1192_v50  ;;  %v1324_v54 = vmax.f32 %v1190_v47, 0.0 }
 0x218   : > { %v1327_v53 = vmax.f32 %v1201_v49, 0.0 }
 0x219   : > { %v1325_v55 = vmax.f32 %v1193_v51, 0.0 }
 0x21a   : > { %v1369_v56 = vpack.c.bf16 %v1327_v53, %v1326_v52 }
 0x21b   : > { %v1368_v57 = vpack.c.bf16 %v1325_v55, %v1324_v54  ;;  %v2216_v58 = vpop.f32.mrb[76].mxu1 }
 0x21c   : > { %v1214_v59 = vadd.f32 %v2216_v58, %v2639_v41  ;;  %v1205_v60 = vpop.f32.mrb[77].mxu1 }
 0x21d   : > { %v1206_v61 = vadd.f32 %v2639_v41, %v1205_v60  ;;  %v2217_v63 = vpop.f32.mrb[78].mxu1  ;;  %2290 = vmatprep.mubr.bf16.mxu0 %v1368_v57 }
 0x21e   : > { %v1217_v0 = vadd.f32 %v2217_v63, %v2639_v41  ;;  %v1208_v2 = vpop.f32.mrb[79].mxu1  ;;  %2291 = vmatmul.mubr.bf16.gmra.mrb[72].mxu0 %v1369_v56  ;;  %v1330_v5 = vmax.f32 %v1214_v59, 0.0 }
 0x21f   : > { %v1209_v4 = vadd.f32 %v2639_v41, %v1208_v2  ;;  %v1328_v8 = vmax.f32 %v1206_v61, 0.0 }
 0x220   : > { %v1331_v7 = vmax.f32 %v1217_v0, 0.0 }
 0x221   : > { %v1329_v9 = vmax.f32 %v1209_v4, 0.0  ;;  %v2709_v4 = vld [vmem:[%s2850_s3 + $0x2] ss:$0 sm:$0xff] }
 0x222   : > { %v1371_v10 = vpack.c.bf16 %v1331_v7, %v1330_v5 }
 0x223   : > { %v1370_v11 = vpack.c.bf16 %v1329_v9, %v1328_v8  ;;  %v2220_v12 = vpop.f32.mrb[80].mxu1 }
 0x224   : > { %v1230_v13 = vadd.f32 %v2220_v12, %v2639_v41  ;;  %v1221_v14 = vpop.f32.mrb[81].mxu1 }
 0x225   : > { %v1222_v15 = vadd.f32 %v2639_v41, %v1221_v14  ;;  %v2221_v16 = vpop.f32.mrb[82].mxu1  ;;  %2294 = vmatprep.mubr.bf16.mxu0 %v1370_v11 }
 0x226   : > { %v1233_v17 = vadd.f32 %v2221_v16, %v2639_v41  ;;  %v1224_v18 = vpop.f32.mrb[83].mxu1  ;;  %2295 = vmatmul.mubr.bf16.gmra.mrb[76].mxu0 %v1371_v10  ;;  %v1334_v20 = vmax.f32 %v1230_v13, 0.0 }
 0x227   : > { %v1225_v19 = vadd.f32 %v2639_v41, %v1224_v18  ;;  %v1332_v22 = vmax.f32 %v1222_v15, 0.0 }
 0x228   : > { %v1335_v21 = vmax.f32 %v1233_v17, 0.0 }
 0x229   : > { %v1333_v23 = vmax.f32 %v1225_v19, 0.0 }
 0x22a   : > { %v1373_v24 = vpack.c.bf16 %v1335_v21, %v1334_v20 }
 0x22b   : > { %v1372_v42 = vpack.c.bf16 %v1333_v23, %v1332_v22  ;;  %v2224_v25 = vpop.f32.mrb[84].mxu1 }
 0x22c   : > { %v1246_v26 = vadd.f32 %v2224_v25, %v2639_v41  ;;  %v1237_v27 = vpop.f32.mrb[85].mxu1 }
 0x22d   : > { %v1238_v29 = vadd.f32 %v2639_v41, %v1237_v27  ;;  %v2225_v30 = vpop.f32.mrb[86].mxu1  ;;  %2298 = vmatprep.mubr.bf16.mxu0 %v1372_v42 }
 0x22e   : > { %v1249_v33 = vadd.f32 %v2225_v30, %v2639_v41  ;;  %v1240_v37 = vpop.f32.mrb[87].mxu1  ;;  %2299 = vmatmul.mubr.bf16.gmra.mrb[80].mxu0 %v1373_v24  ;;  %v1338_v6 = vmax.f32 %v1246_v26, 0.0 }
 0x22f   : > { %v1241_v3 = vadd.f32 %v2639_v41, %v1240_v37  ;;  %v1336_v34 = vmax.f32 %v1238_v29, 0.0 }
 0x230   : > { %v1339_v31 = vmax.f32 %v1249_v33, 0.0 }
 0x231   : > { %v1337_v62 = vmax.f32 %v1241_v3, 0.0 }
 0x232   : > { %v1375_v1 = vpack.c.bf16 %v1339_v31, %v1338_v6 }
 0x233   : > { %v1374_v28 = vpack.c.bf16 %v1337_v62, %v1336_v34  ;;  %v2228_v32 = vpop.f32.mrb[88].mxu1 }
 0x234   : > { %v1262_v35 = vadd.f32 %v2228_v32, %v2639_v41  ;;  %v1253_v36 = vpop.f32.mrb[89].mxu1 }
 0x235   : > { %v1254_v38 = vadd.f32 %v2639_v41, %v1253_v36  ;;  %v2229_v39 = vpop.f32.mrb[90].mxu1  ;;  %2302 = vmatprep.mubr.bf16.mxu0 %v1374_v28 }
 0x236   : > { %v1265_v40 = vadd.f32 %v2229_v39, %v2639_v41  ;;  %v1256_v43 = vpop.f32.mrb[91].mxu1  ;;  %2303 = vmatmul.mubr.bf16.gmra.mrb[84].mxu0 %v1375_v1  ;;  %v1342_v45 = vmax.f32 %v1262_v35, 0.0 }
 0x237   : > { %v1257_v44 = vadd.f32 %v2639_v41, %v1256_v43  ;;  %v1340_v47 = vmax.f32 %v1254_v38, 0.0 }
 0x238   : > { %v1343_v46 = vmax.f32 %v1265_v40, 0.0 }
 0x239   : > { %v1341_v48 = vmax.f32 %v1257_v44, 0.0 }
 0x23a   : > { %v1377_v49 = vpack.c.bf16 %v1343_v46, %v1342_v45 }
 0x23b   : > { %v1376_v50 = vpack.c.bf16 %v1341_v48, %v1340_v47  ;;  %v2232_v51 = vpop.f32.mrb[92].mxu1 }
 0x23c   : > { %v1278_v52 = vadd.f32 %v2232_v51, %v2639_v41  ;;  %v1269_v53 = vpop.f32.mrb[93].mxu1 }
 0x23d   : > { %v1270_v54 = vadd.f32 %v2639_v41, %v1269_v53  ;;  %v2233_v55 = vpop.f32.mrb[94].mxu1  ;;  %2306 = vmatprep.mubr.bf16.mxu0 %v1376_v50 }
 0x23e   : > { %v1281_v56 = vadd.f32 %v2233_v55, %v2639_v41  ;;  %v1272_v57 = vpop.f32.mrb[95].mxu1  ;;  %2307 = vmatmul.mubr.bf16.gmra.mrb[88].mxu0 %v1377_v49  ;;  %v1346_v59 = vmax.f32 %v1278_v52, 0.0 }
 0x23f   : > { %v1273_v58 = vadd.f32 %v2639_v41, %v1272_v57  ;;  %v1344_v61 = vmax.f32 %v1270_v54, 0.0 }
 0x240   : > { %v1347_v60 = vmax.f32 %v1281_v56, 0.0 }
 0x241   : > { %v1345_v63 = vmax.f32 %v1273_v58, 0.0 }
 0x242   : > { %v1379_v0 = vpack.c.bf16 %v1347_v60, %v1346_v59 }
 0x243   : > { %v1378_v2 = vpack.c.bf16 %v1345_v63, %v1344_v61 }
 0x245   : > { %2310 = vmatprep.mubr.bf16.mxu0 %v1378_v2 }
 0x246   : > { %2311 = vmatmul.mubr.bf16.gmra.mrb[92].mxu0 %v1379_v0 }
 0x2a1   : > { %v2252_v41 = vpop.f32.mrb[32].mxu0 }
 0x2a2   : > { %v1496_v5 = vadd.f32 %v2252_v41, %v2709_v4  ;;  %v1487_v7 = vpop.f32.mrb[33].mxu0 }
 0x2a3   : > { %v1488_v8 = vadd.f32 %v2709_v4, %v1487_v7  ;;  %v2253_v9 = vpop.f32.mrb[34].mxu0 }
 0x2a4   : > { %1744 = vst [vmem:[%s2714_s16 + $0x10] sm:$0xff] %v1496_v5  ;;  %v1499_v10 = vadd.f32 %v2253_v9, %v2709_v4  ;;  %v1490_v11 = vpop.f32.mrb[35].mxu0 }
 0x2a5   : > { %1742 = vst [vmem:[%s2714_s16] sm:$0xff] %v1488_v8  ;;  %v1491_v12 = vadd.f32 %v2709_v4, %v1490_v11 }
 0x2a6   : > { %1745 = vst [vmem:[%s2714_s16 + $0x18] sm:$0xff] %v1499_v10 }
 0x2a7   : > { %1743 = vst [vmem:[%s2714_s16 + $0x8] sm:$0xff] %v1491_v12 }
 0x2a9   : > { %v2256_v13 = vpop.f32.mrb[36].mxu0 }
 0x2aa   : > { %v1512_v14 = vadd.f32 %v2256_v13, %v2709_v4  ;;  %v1503_v15 = vpop.f32.mrb[37].mxu0 }
 0x2ab   : > { %v1504_v16 = vadd.f32 %v2709_v4, %v1503_v15  ;;  %v2257_v17 = vpop.f32.mrb[38].mxu0 }
 0x2ac   : > { %1748 = vst [vmem:[%s2714_s16 + $0x30] sm:$0xff] %v1512_v14  ;;  %v1515_v18 = vadd.f32 %v2257_v17, %v2709_v4  ;;  %v1506_v19 = vpop.f32.mrb[39].mxu0 }
 0x2ad   : > { %1746 = vst [vmem:[%s2714_s16 + $0x20] sm:$0xff] %v1504_v16  ;;  %v1507_v20 = vadd.f32 %v2709_v4, %v1506_v19 }
 0x2ae   : > { %1749 = vst [vmem:[%s2714_s16 + $0x38] sm:$0xff] %v1515_v18 }
 0x2af   : > { %1747 = vst [vmem:[%s2714_s16 + $0x28] sm:$0xff] %v1507_v20 }
 0x2b1   : > { %v2260_v21 = vpop.f32.mrb[40].mxu0 }
 0x2b2   : > { %v1528_v22 = vadd.f32 %v2260_v21, %v2709_v4  ;;  %v1519_v23 = vpop.f32.mrb[41].mxu0 }
 0x2b3   : > { %v1520_v24 = vadd.f32 %v2709_v4, %v1519_v23  ;;  %v2261_v42 = vpop.f32.mrb[42].mxu0 }
 0x2b4   : > { %1752 = vst [vmem:[%s2714_s16 + $0x50] sm:$0xff] %v1528_v22  ;;  %v1531_v25 = vadd.f32 %v2261_v42, %v2709_v4  ;;  %v1522_v26 = vpop.f32.mrb[43].mxu0 }
 0x2b5   : > { %1750 = vst [vmem:[%s2714_s16 + $0x40] sm:$0xff] %v1520_v24  ;;  %v1523_v27 = vadd.f32 %v2709_v4, %v1522_v26 }
 0x2b6   : > { %1753 = vst [vmem:[%s2714_s16 + $0x58] sm:$0xff] %v1531_v25 }
 0x2b7   : > { %1751 = vst [vmem:[%s2714_s16 + $0x48] sm:$0xff] %v1523_v27 }
 0x2b9   : > { %v2264_v29 = vpop.f32.mrb[44].mxu0 }
 0x2ba   : > { %v1544_v30 = vadd.f32 %v2264_v29, %v2709_v4  ;;  %v1535_v33 = vpop.f32.mrb[45].mxu0 }
 0x2bb   : > { %v1536_v37 = vadd.f32 %v2709_v4, %v1535_v33  ;;  %v2265_v3 = vpop.f32.mrb[46].mxu0 }
 0x2bc   : > { %1756 = vst [vmem:[%s2714_s16 + $0x70] sm:$0xff] %v1544_v30  ;;  %v1547_v6 = vadd.f32 %v2265_v3, %v2709_v4  ;;  %v1538_v31 = vpop.f32.mrb[47].mxu0 }
 0x2bd   : > { %1754 = vst [vmem:[%s2714_s16 + $0x60] sm:$0xff] %v1536_v37  ;;  %v1539_v34 = vadd.f32 %v2709_v4, %v1538_v31 }
 0x2be   : > { %1757 = vst [vmem:[%s2714_s16 + $0x78] sm:$0xff] %v1547_v6 }
 0x2bf   : > { %1755 = vst [vmem:[%s2714_s16 + $0x68] sm:$0xff] %v1539_v34 }
 0x2c1   : > { %v2268_v62 = vpop.f32.mrb[48].mxu0 }
 0x2c2   : > { %v1560_v1 = vadd.f32 %v2268_v62, %v2709_v4  ;;  %v1551_v28 = vpop.f32.mrb[49].mxu0 }
 0x2c3   : > { %v1552_v32 = vadd.f32 %v2709_v4, %v1551_v28  ;;  %v2269_v35 = vpop.f32.mrb[50].mxu0 }
 0x2c4   : > { %1760 = vst [vmem:[%s2714_s16 + $0x90] sm:$0xff] %v1560_v1  ;;  %v1563_v36 = vadd.f32 %v2269_v35, %v2709_v4  ;;  %v1554_v38 = vpop.f32.mrb[51].mxu0 }
 0x2c5   : > { %1758 = vst [vmem:[%s2714_s16 + $0x80] sm:$0xff] %v1552_v32  ;;  %v1555_v39 = vadd.f32 %v2709_v4, %v1554_v38 }
 0x2c6   : > { %1761 = vst [vmem:[%s2714_s16 + $0x98] sm:$0xff] %v1563_v36 }
 0x2c7   : > { %1759 = vst [vmem:[%s2714_s16 + $0x88] sm:$0xff] %v1555_v39 }
 0x2c9   : > { %v2272_v40 = vpop.f32.mrb[52].mxu0 }
 0x2ca   : > { %v1576_v43 = vadd.f32 %v2272_v40, %v2709_v4  ;;  %v1567_v44 = vpop.f32.mrb[53].mxu0 }
 0x2cb   : > { %v1568_v45 = vadd.f32 %v2709_v4, %v1567_v44  ;;  %v2273_v46 = vpop.f32.mrb[54].mxu0 }
 0x2cc   : > { %1764 = vst [vmem:[%s2714_s16 + $0xb0] sm:$0xff] %v1576_v43  ;;  %v1579_v47 = vadd.f32 %v2273_v46, %v2709_v4  ;;  %v1570_v48 = vpop.f32.mrb[55].mxu0 }
 0x2cd   : > { %1762 = vst [vmem:[%s2714_s16 + $0xa0] sm:$0xff] %v1568_v45  ;;  %v1571_v49 = vadd.f32 %v2709_v4, %v1570_v48 }
 0x2ce   : > { %1765 = vst [vmem:[%s2714_s16 + $0xb8] sm:$0xff] %v1579_v47 }
 0x2cf   : > { %1763 = vst [vmem:[%s2714_s16 + $0xa8] sm:$0xff] %v1571_v49 }
 0x2d1   : > { %v2276_v50 = vpop.f32.mrb[56].mxu0 }
 0x2d2   : > { %v1592_v51 = vadd.f32 %v2276_v50, %v2709_v4  ;;  %v1583_v52 = vpop.f32.mrb[57].mxu0 }
 0x2d3   : > { %v1584_v53 = vadd.f32 %v2709_v4, %v1583_v52  ;;  %v2277_v54 = vpop.f32.mrb[58].mxu0 }
 0x2d4   : > { %1768 = vst [vmem:[%s2714_s16 + $0xd0] sm:$0xff] %v1592_v51  ;;  %v1595_v55 = vadd.f32 %v2277_v54, %v2709_v4  ;;  %v1586_v56 = vpop.f32.mrb[59].mxu0 }
 0x2d5   : > { %1766 = vst [vmem:[%s2714_s16 + $0xc0] sm:$0xff] %v1584_v53  ;;  %v1587_v57 = vadd.f32 %v2709_v4, %v1586_v56 }
 0x2d6   : > { %1769 = vst [vmem:[%s2714_s16 + $0xd8] sm:$0xff] %v1595_v55 }
 0x2d7   : > { %1767 = vst [vmem:[%s2714_s16 + $0xc8] sm:$0xff] %v1587_v57 }
 0x2d9   : > { %v2280_v58 = vpop.f32.mrb[60].mxu0 }
 0x2da   : > { %v1608_v59 = vadd.f32 %v2280_v58, %v2709_v4  ;;  %v1599_v60 = vpop.f32.mrb[61].mxu0 }
 0x2db   : > { %v1600_v61 = vadd.f32 %v2709_v4, %v1599_v60  ;;  %v2281_v63 = vpop.f32.mrb[62].mxu0 }
 0x2dc   : > { %1772 = vst [vmem:[%s2714_s16 + $0xf0] sm:$0xff] %v1608_v59  ;;  %v1611_v0 = vadd.f32 %v2281_v63, %v2709_v4  ;;  %v1602_v2 = vpop.f32.mrb[63].mxu0 }
 0x2dd   : > { %1770 = vst [vmem:[%s2714_s16 + $0xe0] sm:$0xff] %v1600_v61  ;;  %v1603_v41 = vadd.f32 %v2709_v4, %v1602_v2 }
 0x2de   : > { %1773 = vst [vmem:[%s2714_s16 + $0xf8] sm:$0xff] %v1611_v0 }
 0x2df   : > { %1771 = vst [vmem:[%s2714_s16 + $0xe8] sm:$0xff] %v1603_v41 }
 0x2e1   : > { %v2284_v5 = vpop.f32.mrb[64].mxu0 }
 0x2e2   : > { %v1624_v7 = vadd.f32 %v2284_v5, %v2709_v4  ;;  %v1615_v8 = vpop.f32.mrb[65].mxu0 }
 0x2e3   : > { %v1616_v9 = vadd.f32 %v2709_v4, %v1615_v8  ;;  %v2285_v10 = vpop.f32.mrb[66].mxu0 }
 0x2e4   : > { %1776 = vst [vmem:[%s2714_s16 + $0x110] sm:$0xff] %v1624_v7  ;;  %v1627_v11 = vadd.f32 %v2285_v10, %v2709_v4  ;;  %v1618_v12 = vpop.f32.mrb[67].mxu0 }
 0x2e5   : > { %1774 = vst [vmem:[%s2714_s16 + $0x100] sm:$0xff] %v1616_v9  ;;  %v1619_v13 = vadd.f32 %v2709_v4, %v1618_v12 }
 0x2e6   : > { %1777 = vst [vmem:[%s2714_s16 + $0x118] sm:$0xff] %v1627_v11 }
 0x2e7   : > { %1775 = vst [vmem:[%s2714_s16 + $0x108] sm:$0xff] %v1619_v13 }
 0x2e9   : > { %v2288_v14 = vpop.f32.mrb[68].mxu0 }
 0x2ea   : > { %v1640_v15 = vadd.f32 %v2288_v14, %v2709_v4  ;;  %v1631_v16 = vpop.f32.mrb[69].mxu0 }
 0x2eb   : > { %v1632_v17 = vadd.f32 %v2709_v4, %v1631_v16  ;;  %v2289_v18 = vpop.f32.mrb[70].mxu0 }
 0x2ec   : > { %1780 = vst [vmem:[%s2714_s16 + $0x130] sm:$0xff] %v1640_v15  ;;  %v1643_v19 = vadd.f32 %v2289_v18, %v2709_v4  ;;  %v1634_v20 = vpop.f32.mrb[71].mxu0 }
 0x2ed   : > { %1778 = vst [vmem:[%s2714_s16 + $0x120] sm:$0xff] %v1632_v17  ;;  %v1635_v21 = vadd.f32 %v2709_v4, %v1634_v20 }
 0x2ee   : > { %1781 = vst [vmem:[%s2714_s16 + $0x138] sm:$0xff] %v1643_v19 }
 0x2ef   : > { %1779 = vst [vmem:[%s2714_s16 + $0x128] sm:$0xff] %v1635_v21 }
 0x2f1   : > { %v2292_v22 = vpop.f32.mrb[72].mxu0 }
 0x2f2   : > { %v1656_v23 = vadd.f32 %v2292_v22, %v2709_v4  ;;  %v1647_v24 = vpop.f32.mrb[73].mxu0 }
 0x2f3   : > { %v1648_v42 = vadd.f32 %v2709_v4, %v1647_v24  ;;  %v2293_v25 = vpop.f32.mrb[74].mxu0 }
 0x2f4   : > { %1784 = vst [vmem:[%s2714_s16 + $0x150] sm:$0xff] %v1656_v23  ;;  %v1659_v26 = vadd.f32 %v2293_v25, %v2709_v4  ;;  %v1650_v27 = vpop.f32.mrb[75].mxu0 }
 0x2f5   : > { %1782 = vst [vmem:[%s2714_s16 + $0x140] sm:$0xff] %v1648_v42  ;;  %v1651_v29 = vadd.f32 %v2709_v4, %v1650_v27 }
 0x2f6   : > { %1785 = vst [vmem:[%s2714_s16 + $0x158] sm:$0xff] %v1659_v26 }
 0x2f7   : > { %1783 = vst [vmem:[%s2714_s16 + $0x148] sm:$0xff] %v1651_v29 }
 0x2f9   : > { %v2296_v30 = vpop.f32.mrb[76].mxu0 }
 0x2fa   : > { %v1672_v33 = vadd.f32 %v2296_v30, %v2709_v4  ;;  %v1663_v37 = vpop.f32.mrb[77].mxu0 }
 0x2fb   : > { %v1664_v3 = vadd.f32 %v2709_v4, %v1663_v37  ;;  %v2297_v6 = vpop.f32.mrb[78].mxu0 }
 0x2fc   : > { %1788 = vst [vmem:[%s2714_s16 + $0x170] sm:$0xff] %v1672_v33  ;;  %v1675_v31 = vadd.f32 %v2297_v6, %v2709_v4  ;;  %v1666_v34 = vpop.f32.mrb[79].mxu0 }
 0x2fd   : > { %1786 = vst [vmem:[%s2714_s16 + $0x160] sm:$0xff] %v1664_v3  ;;  %v1667_v62 = vadd.f32 %v2709_v4, %v1666_v34 }
 0x2fe   : > { %1789 = vst [vmem:[%s2714_s16 + $0x178] sm:$0xff] %v1675_v31 }
 0x2ff   : > { %1787 = vst [vmem:[%s2714_s16 + $0x168] sm:$0xff] %v1667_v62 }
 0x301   : > { %v2300_v1 = vpop.f32.mrb[80].mxu0 }
 0x302   : > { %v1688_v28 = vadd.f32 %v2300_v1, %v2709_v4  ;;  %v1679_v32 = vpop.f32.mrb[81].mxu0 }
 0x303   : > { %v1680_v35 = vadd.f32 %v2709_v4, %v1679_v32  ;;  %v2301_v36 = vpop.f32.mrb[82].mxu0 }
 0x304   : > { %1792 = vst [vmem:[%s2714_s16 + $0x190] sm:$0xff] %v1688_v28  ;;  %v1691_v38 = vadd.f32 %v2301_v36, %v2709_v4  ;;  %v1682_v39 = vpop.f32.mrb[83].mxu0 }
 0x305   : > { %1790 = vst [vmem:[%s2714_s16 + $0x180] sm:$0xff] %v1680_v35  ;;  %v1683_v40 = vadd.f32 %v2709_v4, %v1682_v39 }
 0x306   : > { %1793 = vst [vmem:[%s2714_s16 + $0x198] sm:$0xff] %v1691_v38 }
 0x307   : > { %1791 = vst [vmem:[%s2714_s16 + $0x188] sm:$0xff] %v1683_v40 }
 0x309   : > { %v2304_v43 = vpop.f32.mrb[84].mxu0 }
 0x30a   : > { %v1704_v44 = vadd.f32 %v2304_v43, %v2709_v4  ;;  %v1695_v45 = vpop.f32.mrb[85].mxu0 }
 0x30b   : > { %v1696_v46 = vadd.f32 %v2709_v4, %v1695_v45  ;;  %v2305_v47 = vpop.f32.mrb[86].mxu0 }
 0x30c   : > { %1796 = vst [vmem:[%s2714_s16 + $0x1b0] sm:$0xff] %v1704_v44  ;;  %v1707_v48 = vadd.f32 %v2305_v47, %v2709_v4  ;;  %v1698_v49 = vpop.f32.mrb[87].mxu0 }
 0x30d   : > { %1794 = vst [vmem:[%s2714_s16 + $0x1a0] sm:$0xff] %v1696_v46  ;;  %v1699_v50 = vadd.f32 %v2709_v4, %v1698_v49 }
 0x30e   : > { %1797 = vst [vmem:[%s2714_s16 + $0x1b8] sm:$0xff] %v1707_v48 }
 0x30f   : > { %1795 = vst [vmem:[%s2714_s16 + $0x1a8] sm:$0xff] %v1699_v50 }
 0x311   : > { %v2308_v51 = vpop.f32.mrb[88].mxu0 }
 0x312   : > { %v1720_v52 = vadd.f32 %v2308_v51, %v2709_v4  ;;  %v1711_v53 = vpop.f32.mrb[89].mxu0 }
 0x313   : > { %v1712_v54 = vadd.f32 %v2709_v4, %v1711_v53  ;;  %v2309_v55 = vpop.f32.mrb[90].mxu0 }
 0x314   : > { %1800 = vst [vmem:[%s2714_s16 + $0x1d0] sm:$0xff] %v1720_v52  ;;  %v1723_v56 = vadd.f32 %v2309_v55, %v2709_v4  ;;  %v1714_v57 = vpop.f32.mrb[91].mxu0 }
 0x315   : > { %1798 = vst [vmem:[%s2714_s16 + $0x1c0] sm:$0xff] %v1712_v54  ;;  %v1715_v58 = vadd.f32 %v2709_v4, %v1714_v57 }
 0x316   : > { %1801 = vst [vmem:[%s2714_s16 + $0x1d8] sm:$0xff] %v1723_v56 }
 0x317   : > { %1799 = vst [vmem:[%s2714_s16 + $0x1c8] sm:$0xff] %v1715_v58 }
 0x319   : > { %v2312_v59 = vpop.f32.mrb[92].mxu0 }
 0x31a   : > { %v1736_v60 = vadd.f32 %v2312_v59, %v2709_v4  ;;  %v1727_v61 = vpop.f32.mrb[93].mxu0 }
 0x31b   : > { %v1728_v63 = vadd.f32 %v2709_v4, %v1727_v61  ;;  %v2313_v0 = vpop.f32.mrb[94].mxu0 }
 0x31c   : > { %1804 = vst [vmem:[%s2714_s16 + $0x1f0] sm:$0xff] %v1736_v60  ;;  %v1739_v2 = vadd.f32 %v2313_v0, %v2709_v4  ;;  %v1730_v41 = vpop.f32.mrb[95].mxu0 }
 0x31d   : > { %1802 = vst [vmem:[%s2714_s16 + $0x1e0] sm:$0xff] %v1728_v63  ;;  %v1731_v5 = vadd.f32 %v2709_v4, %v1730_v41 }
 0x31e   : > { %1805 = vst [vmem:[%s2714_s16 + $0x1f8] sm:$0xff] %v1739_v2 }
 0x31f   : > { %1803 = vst [vmem:[%s2714_s16 + $0x1e8] sm:$0xff] %v1731_v5 }
 0x320 PF: > { %s14_s15 = sadd.s32 1, %s2379_s15  }
 0x321   : > { %p11_p4 = scmp.ge.s32.totalorder %s14_s15, 4  }
 0x323   :  { %13 = sbr.rel (!%p11_p4) target bundleno = 1 (0x1), region = 69 }

</bundles_post_ra>
